<compile_context>
chip_gen: v6e
topology: v6e:2x2x1
jax: 0.10.0
libtpu: 0.0.40
codegen_flags: <defaults>
</compile_context>

<pallas_src>
import functools
import math

import jax
import jax.numpy as jnp
from jax import lax
from jax.experimental import pallas as pl
from jax.experimental.pallas import tpu as pltpu


def _round_up(x: int, m: int) -> int:
    return ((x + m - 1) // m) * m


# ---------------------------------------------------------------------------
# Pass 1: H[i-tile] = tanh(...tanh(z W_0 + b_0)... W_{L-1} + b_{L-1})
# (weights already folded: layer 0 concatenated along outputs, deeper layers
#  block-diagonal, last layer zero-padded to K_pad.)
# ---------------------------------------------------------------------------
def _make_mlp_kernel(num_layers: int):
    def kernel(*refs):
        # refs = (z, W_0..W_{L-1}, b_0..b_{L-1}, h_out)
        z_ref = refs[0]
        w_refs = refs[1:1 + num_layers]
        b_refs = refs[1 + num_layers:1 + 2 * num_layers]
        h_out_ref = refs[1 + 2 * num_layers]

        h = z_ref[...]
        for l in range(num_layers):
            # f32 compute path; f32 accumulation on the MXU.
            h = jnp.tanh(
                jnp.dot(h, w_refs[l][...],
                        preferred_element_type=jnp.float32) + b_refs[l][...])
        # Width is K_pad (multiple of 128) -> unmasked full-lane store.
        # Padded columns are tanh(0 + 0) = 0, so they add nothing to H @ H^T.
        h_out_ref[...] = h.astype(h_out_ref.dtype)

    return kernel


# ---------------------------------------------------------------------------
# Pass 2: out[i, j] = H[i-tile] @ H[j-tile]^T  (NT contraction, no explicit .T)
# ---------------------------------------------------------------------------
def _gram_kernel(hi_ref, hj_ref, out_ref):
    out_ref[...] = lax.dot_general(
        hi_ref[...], hj_ref[...],
        dimension_numbers=(((1,), (1,)), ((), ())),
        preferred_element_type=jnp.float32,
    ).astype(out_ref.dtype)
    # Note: output is symmetric; mirroring i<=j tiles would halve MXU work but
    # write bytes dominate with f32 output, so it is not done here.


def _choose_tiles(n, mlp_row_tile, row_tile, col_tile, out_bytes):
    """Quantize/validate tiles and compute the padded N (tile multiple)."""
    tn = _round_up(col_tile if col_tile else min(512, _round_up(n, 128)), 128)
    tm = _round_up(row_tile if row_tile else min(1024, _round_up(n, 128)), 16)
    tm_h = _round_up(
        mlp_row_tile if mlp_row_tile else min(512, _round_up(n, 128)), 16)
    # Keep the double-buffered (tm, tn) output tile well under the 32 MiB
    # scoped VMEM default (also v7x 64 MiB-physical safe).
    if 2 * tm * tn * out_bytes > 16 * 1024 * 1024:
        raise ValueError(
            f"row_tile x col_tile = {tm} x {tn} too large for VMEM budget")
    n_pad = _round_up(n, math.lcm(tm, tn, tm_h))
    return tm_h, tm, tn, n_pad


def _fold_weights(weights, biases, k_pad):
    """Fold per-relation MLP weights into wide / block-diagonal matrices."""
    num_layers = len(weights)
    num_rel = weights[0].shape[0]
    ws, bs = [], []
    for l in range(num_layers):
        w = weights[l]                       # (R, din, dout)
        b = biases[l]                        # (R, 1, dout)
        _, din, dout = w.shape
        if l == 0:
            # z is shared across relations: concat along the output dim.
            wf = jnp.transpose(w, (1, 0, 2)).reshape(din, num_rel * dout)
        else:
            # Block-diagonal stack: (R*din, R*dout).
            eye = jnp.eye(num_rel, dtype=w.dtype)
            wf = jnp.einsum('rs,rij->risj', eye, w).reshape(
                num_rel * din, num_rel * dout)
        bf = b.reshape(num_rel, dout).reshape(1, num_rel * dout)
        if l == num_layers - 1 and num_rel * dout < k_pad:
            wf = jnp.pad(wf, ((0, 0), (0, k_pad - num_rel * dout)))
            bf = jnp.pad(bf, ((0, 0), (0, k_pad - num_rel * dout)))
        ws.append(wf)
        bs.append(bf)
    return ws, bs


@functools.partial(
    jax.jit,
    static_argnames=("h_dtype", "out_dtype",
                     "mlp_row_tile", "row_tile", "col_tile"))
def maped_inner_product_decoder(z, weights, biases, *,
                                h_dtype=jnp.bfloat16,
                                out_dtype=jnp.float32,
                                mlp_row_tile=None, row_tile=None,
                                col_tile=None):
    """z: (N, F) f32.  weights[l]: (R, in_l, out_l).  biases[l]: (R, 1, out_l)."""
    n, f = z.shape
    num_rel = weights[0].shape[0]
    num_layers = len(weights)
    d_last = weights[-1].shape[-1]
    k = num_rel * d_last
    k_pad = _round_up(k, 128)                 # lane-aligned concatenated dim

    out_bytes = jnp.dtype(out_dtype).itemsize
    tm_h, tm, tn, n_pad = _choose_tiles(
        n, mlp_row_tile, row_tile, col_tile, out_bytes)

    # Tiny trace-time transforms: fold per-relation weights into wide matmuls.
    ws, bs = _fold_weights(weights, biases, k_pad)

    z_p = z if n_pad == n else jnp.pad(z, ((0, n_pad - n), (0, 0)))

    # ---- Pass 1: H (n_pad, K_pad) ----
    mlp_in_specs = [pl.BlockSpec((tm_h, f), lambda i: (i, 0))]
    # Weights/biases are tiny: full-extent blocks, constant index ->
    # DMA'd once and kept resident in VMEM across the whole grid.
    for w in ws:
        mlp_in_specs.append(pl.BlockSpec(w.shape, lambda i: (0, 0)))
    for b in bs:
        mlp_in_specs.append(pl.BlockSpec(b.shape, lambda i: (0, 0)))

    h_cat = pl.pallas_call(
        _make_mlp_kernel(num_layers),
        out_shape=jax.ShapeDtypeStruct((n_pad, k_pad), h_dtype),
        grid_spec=pltpu.PrefetchScalarGridSpec(
            num_scalar_prefetch=0,
            grid=(n_pad // tm_h,),
            in_specs=mlp_in_specs,
            out_specs=pl.BlockSpec((tm_h, k_pad), lambda i: (i, 0)),
        ),
        compiler_params=pltpu.CompilerParams(
            dimension_semantics=("parallel",),
            vmem_limit_bytes=32 * 1024 * 1024),
    )(z_p, *ws, *bs)

    # ---- Pass 2: out = H @ H^T ----
    # i is the outer grid dim: the (tm, K_pad) LHS block index is constant
    # across the inner j loop, so it stays resident (no re-DMA).
    out = pl.pallas_call(
        _gram_kernel,
        out_shape=jax.ShapeDtypeStruct((n_pad, n_pad), out_dtype),
        grid_spec=pltpu.PrefetchScalarGridSpec(
            num_scalar_prefetch=0,
            grid=(n_pad // tm, n_pad // tn),
            in_specs=[pl.BlockSpec((tm, k_pad), lambda i, j: (i, 0)),
                      pl.BlockSpec((tn, k_pad), lambda i, j: (j, 0))],
            out_specs=pl.BlockSpec((tm, tn), lambda i, j: (i, j)),
        ),
        compiler_params=pltpu.CompilerParams(
            dimension_semantics=("parallel", "parallel"),
            vmem_limit_bytes=32 * 1024 * 1024),
    )(h_cat, h_cat)

    if n_pad != n:
        out = out[:n, :n]
    return out


# ---------------------------------------------------------------------------
# Params / reference
# ---------------------------------------------------------------------------
def init_params(key, num_relations, in_size, layers):
    """Deterministic Linear-layer init (uniform, torch-like fan_in scaling)."""
    dims = [in_size] + list(layers)
    weights, biases = [], []
    for l in range(len(layers)):
        key, kw, kb = jax.random.split(key, 3)
        bound = 1.0 / jnp.sqrt(dims[l])
        w = jax.random.uniform(
            kw, (num_relations, dims[l], dims[l + 1]),
            minval=-bound, maxval=bound, dtype=jnp.float32)
        b = jax.random.uniform(
            kb, (num_relations, 1, dims[l + 1]),
            minval=-bound, maxval=bound, dtype=jnp.float32)
        weights.append(w)
        biases.append(b)
    return weights, biases


def reference(z, weights, biases):
    """Plain-JAX reference of the PyTorch forward."""
    num_rel = weights[0].shape[0]
    acc = jnp.zeros((z.shape[0], z.shape[0]), jnp.float32)
    for r in range(num_rel):
        h = z
        for w, b in zip(weights, biases):
            h = jnp.tanh(h @ w[r] + b[r])
        acc = acc + h @ h.T
    return acc


if __name__ == "__main__":
    # Small, module-consistent shapes: N nodes, in_size features,
    # node_mlp layers [64, 32], 3 latent relation layers.
    N, in_size = 256, 32
    layers = [64, 32]
    num_relations = 3

    key = jax.random.PRNGKey(0)
    key, kz = jax.random.split(key)
    z = jax.random.normal(kz, (N, in_size), dtype=jnp.float32)
    weights, biases = init_params(key, num_relations, in_size, layers)

    ref = reference(z, weights, biases)

    # Exact-precision path (f32 H); 128-tiles so this small test exercises the
    # 2x2 output-tile grid and the multi-step pass-1 grid.
    out_f32 = maped_inner_product_decoder(
        z, weights, biases, h_dtype=jnp.float32,
        mlp_row_tile=128, row_tile=128, col_tile=128)
    out_f32 = jax.block_until_ready(out_f32)
    assert out_f32.shape == (N, N)
    assert jnp.allclose(out_f32, ref, atol=2e-3, rtol=2e-3)

    # Default perf path: bf16 H storage (f32 accumulation); documented
    # precision trade-off -> looser tolerance.
    out_def = maped_inner_product_decoder(z, weights, biases)
    out_def = jax.block_until_ready(out_def)
    assert out_def.shape == (N, N)
    assert jnp.allclose(out_def, ref, atol=0.5, rtol=0.05)

    print("KERNEL_OK")
</pallas_src>

<mosaic_0001>
module attributes {stable_mosaic.version = 11 : i64} {
  func.func @kernel(%arg0: i32, %arg1: memref<128x32xf32, #tpu.memory_space<vmem>>, %arg2: memref<32x192xf32, #tpu.memory_space<vmem>>, %arg3: memref<192x128xf32, #tpu.memory_space<vmem>>, %arg4: memref<1x192xf32, #tpu.memory_space<vmem>>, %arg5: memref<1x128xf32, #tpu.memory_space<vmem>>, %arg6: memref<128x128xf32, #tpu.memory_space<vmem>>) attributes {dimension_semantics = [#tpu.dimension_semantics<parallel>], iteration_bounds = array<i64: 2>, scalar_prefetch = 0 : i64, scratch_operands = 0 : i64, tpu.core_type = #tpu.core_type<tc>, window_params = [{transform_indices = @transform_0, window_bounds = array<i64: 128, 32>}, {pipeline_mode = #tpu.pipeline_mode<synchronous>, transform_indices = @transform_1, window_bounds = array<i64: 32, 192>}, {pipeline_mode = #tpu.pipeline_mode<synchronous>, transform_indices = @transform_2, window_bounds = array<i64: 192, 128>}, {pipeline_mode = #tpu.pipeline_mode<synchronous>, transform_indices = @transform_3, window_bounds = array<i64: 1, 192>}, {pipeline_mode = #tpu.pipeline_mode<synchronous>, transform_indices = @transform_4, window_bounds = array<i64: 1, 128>}, {transform_indices = @transform_5, window_bounds = array<i64: 128, 128>}]} {
    %c0 = arith.constant 0 : index
    %c0_0 = arith.constant 0 : index
    %0 = vector.load %arg1[%c0, %c0_0] : memref<128x32xf32, #tpu.memory_space<vmem>>, vector<128x32xf32>
    %c0_1 = arith.constant 0 : index
    %c0_2 = arith.constant 0 : index
    %1 = vector.load %arg2[%c0_1, %c0_2] : memref<32x192xf32, #tpu.memory_space<vmem>>, vector<32x192xf32>
    %cst = arith.constant dense<0.000000e+00> : vector<128x192xf32>
    %2 = tpu.matmul %0, %1, %cst {dimension_numbers = #tpu.dot_dimension_numbers<[1], [0], [0], [1], [0, 0, 1, 1], [], []>} : vector<128x32xf32>, vector<32x192xf32>, vector<128x192xf32> -> vector<128x192xf32>
    %c0_3 = arith.constant 0 : index
    %c0_4 = arith.constant 0 : index
    %3 = vector.load %arg4[%c0_3, %c0_4] : memref<1x192xf32, #tpu.memory_space<vmem>>, vector<1x192xf32>
    %4 = vector.broadcast %3 : vector<1x192xf32> to vector<128x192xf32>
    %5 = arith.addf %2, %4 : vector<128x192xf32>
    %6 = math.tanh %5 : vector<128x192xf32>
    %c0_5 = arith.constant 0 : index
    %c0_6 = arith.constant 0 : index
    %7 = vector.load %arg3[%c0_5, %c0_6] : memref<192x128xf32, #tpu.memory_space<vmem>>, vector<192x128xf32>
    %cst_7 = arith.constant dense<0.000000e+00> : vector<128x128xf32>
    %8 = tpu.matmul %6, %7, %cst_7 {dimension_numbers = #tpu.dot_dimension_numbers<[1], [0], [0], [1], [0, 0, 1, 1], [], []>} : vector<128x192xf32>, vector<192x128xf32>, vector<128x128xf32> -> vector<128x128xf32>
    %c0_8 = arith.constant 0 : index
    %c0_9 = arith.constant 0 : index
    %9 = vector.load %arg5[%c0_8, %c0_9] : memref<1x128xf32, #tpu.memory_space<vmem>>, vector<1x128xf32>
    %10 = vector.broadcast %9 : vector<1x128xf32> to vector<128x128xf32>
    %11 = arith.addf %8, %10 : vector<128x128xf32>
    %12 = math.tanh %11 : vector<128x128xf32>
    %c0_10 = arith.constant 0 : index
    %c0_11 = arith.constant 0 : index
    %13 = vector.load %arg6[%c0_10, %c0_11] : memref<128x128xf32, #tpu.memory_space<vmem>>, vector<128x128xf32>
    tpu.vector_store %arg6[%c0_10, %c0_11], %12 {strides = array<i32>} : memref<128x128xf32, #tpu.memory_space<vmem>>, vector<128x128xf32>,
    return
  }
  func.func @transform_0(%arg0: i32) -> (i32, i32) {
    %c0_i32 = arith.constant 0 : i32
    %c0_i32_0 = arith.constant 0 : i32
    return %arg0, %c0_i32 : i32, i32
  }
  func.func @transform_1(%arg0: i32) -> (i32, i32) {
    %c0_i32 = arith.constant 0 : i32
    %c0_i32_0 = arith.constant 0 : i32
    %c0_i32_1 = arith.constant 0 : i32
    return %c0_i32, %c0_i32_0 : i32, i32
  }
  func.func @transform_2(%arg0: i32) -> (i32, i32) {
    %c0_i32 = arith.constant 0 : i32
    %c0_i32_0 = arith.constant 0 : i32
    %c0_i32_1 = arith.constant 0 : i32
    return %c0_i32, %c0_i32_0 : i32, i32
  }
  func.func @transform_3(%arg0: i32) -> (i32, i32) {
    %c0_i32 = arith.constant 0 : i32
    %c0_i32_0 = arith.constant 0 : i32
    %c0_i32_1 = arith.constant 0 : i32
    return %c0_i32, %c0_i32_0 : i32, i32
  }
  func.func @transform_4(%arg0: i32) -> (i32, i32) {
    %c0_i32 = arith.constant 0 : i32
    %c0_i32_0 = arith.constant 0 : i32
    %c0_i32_1 = arith.constant 0 : i32
    return %c0_i32, %c0_i32_0 : i32, i32
  }
  func.func @transform_5(%arg0: i32) -> (i32, i32) {
    %c0_i32 = arith.constant 0 : i32
    %c0_i32_0 = arith.constant 0 : i32
    return %arg0, %c0_i32 : i32, i32
  }
}

module attributes {stable_mosaic.version = 11 : i64} {
  func.func @_gram_kernel(%arg0: i32, %arg1: i32, %arg2: memref<128x128xf32, #tpu.memory_space<vmem>>, %arg3: memref<128x128xf32, #tpu.memory_space<vmem>>, %arg4: memref<128x128xf32, #tpu.memory_space<vmem>>) attributes {dimension_semantics = [#tpu.dimension_semantics<parallel>, #tpu.dimension_semantics<parallel>], iteration_bounds = array<i64: 2, 2>, scalar_prefetch = 0 : i64, scratch_operands = 0 : i64, tpu.core_type = #tpu.core_type<tc>, window_params = [{transform_indices = @transform_0, window_bounds = array<i64: 128, 128>}, {transform_indices = @transform_1, window_bounds = array<i64: 128, 128>}, {transform_indices = @transform_2, window_bounds = array<i64: 128, 128>}]} {
    %c0 = arith.constant 0 : index
    %c0_0 = arith.constant 0 : index
    %0 = vector.load %arg2[%c0, %c0_0] : memref<128x128xf32, #tpu.memory_space<vmem>>, vector<128x128xf32>
    %c0_1 = arith.constant 0 : index
    %c0_2 = arith.constant 0 : index
    %1 = vector.load %arg3[%c0_1, %c0_2] : memref<128x128xf32, #tpu.memory_space<vmem>>, vector<128x128xf32>
    %cst = arith.constant dense<0.000000e+00> : vector<128x128xf32>
    %2 = tpu.matmul %0, %1, %cst {dimension_numbers = #tpu.dot_dimension_numbers<[1], [1], [0], [0], [0, 0, 1, 0], [], []>} : vector<128x128xf32>, vector<128x128xf32>, vector<128x128xf32> -> vector<128x128xf32>
    %c0_3 = arith.constant 0 : index
    %c0_4 = arith.constant 0 : index
    %3 = vector.load %arg4[%c0_3, %c0_4] : memref<128x128xf32, #tpu.memory_space<vmem>>, vector<128x128xf32>
    tpu.vector_store %arg4[%c0_3, %c0_4], %2 {strides = array<i32>} : memref<128x128xf32, #tpu.memory_space<vmem>>, vector<128x128xf32>,
    return
  }
  func.func @transform_0(%arg0: i32, %arg1: i32) -> (i32, i32) {
    %c0_i32 = arith.constant 0 : i32
    %c0_i32_0 = arith.constant 0 : i32
    return %arg0, %c0_i32 : i32, i32
  }
  func.func @transform_1(%arg0: i32, %arg1: i32) -> (i32, i32) {
    %c0_i32 = arith.constant 0 : i32
    %c0_i32_0 = arith.constant 0 : i32
    return %arg1, %c0_i32 : i32, i32
  }
  func.func @transform_2(%arg0: i32, %arg1: i32) -> (i32, i32) {
    %c0_i32 = arith.constant 0 : i32
    return %arg0, %arg1 : i32, i32
  }
}

</mosaic_0001>

<bundles_post_ra>
// kernel: maped_inner_product_decoder.3
= control target key start
LH: loop header
LB: loop body
LE: loop exit
PB: predicated region body
PF: predicated region fallthrough
CT: control target
= control target key end

     0   :  { %7 = vsyncpa [#allocation3], 0  ;;  %s1000_s0 = inlined_call_operand.vmem [shape: f32[256,128], index: 0, kind: input, shape index: {}, may-alias: {0,1}]   ;;  %s1001_s1 = inlined_call_operand.vmem [shape: f32[256,128], index: 1, kind: input, shape index: {}, may-alias: {0,1}]   ;;  %s1002_s2 = inlined_call_operand.hbm [shape: f32[256,256], index: 2, kind: output, shape index: {}]  }
   0x1   :  { %9 = vsyncpa [#allocation3 + $0x1], 0  ;;  %s801_s9 = smov 0   ;;  %s803_s10 = smov 0  }
   0x2   :  { %s805_s11 = smov 0   ;;  %s807_s12 = smov 0  }
   0x3   :  { %s809_s13 = smov 0   ;;  %s811_s14 = smov 0  }
   0x4   :  { %s813_s15 = smov 0   ;;  %s815_s16 = smov 0  }
   0x5 LB: > { %s477_s17 = sadd.s32 4294967295, %s780_s16   ;;  %s478_s18 = sadd.s32 4294967294, %s780_s16   ;;  %s780_s16 = sphi %s815_s16, %s15_s16   ;;  %s776_s15 = sphi %s813_s15, %s1011_s15   ;;  %s772_s14 = sphi %s811_s14, %s1010_s14   ;;  %s768_s13 = sphi %s809_s13, %s1009_s13   ;;  %s764_s12 = sphi %s807_s12, %s1008_s12   ;;  %s760_s11 = sphi %s805_s11, %s1007_s11   ;;  %s756_s10 = sphi %s803_s10, %s1006_s10   ;;  %s752_s9 = sphi %s801_s9, %s1005_s9  }
   0x6   : > { %s24_s19 = sadd.s32 1, %s772_s14  ;;  %s27_s20 = sadd.s32 1, %s776_s15 }
   0x7   : > { %p25_p0 = scmp.ge.s32.totalorder %s24_s19, 2  ;;  %p98_p1 = scmp.ne.s32.totalorder %s760_s11, %s756_s10 }
   0x8   : > { %p99_p2 = scmp.eq.s32.totalorder %s477_s17, 3  ;;  %p104_p5 = scmp.ne.s32.totalorder %s756_s10, %s752_s9 }
   0x9   : > { %s1013_s19 = smov (%p25_p0, %s24_s19), 0  ;;  %s1015_s20 = smov (!%p25_p0, %s27_s20), %s776_s15 }
   0xa   : > { %s84_s21 = ssub.s32 %s772_s14, %s1013_s19  ;;  %p852_p3 = por %p99_p2, %p98_p1 }
   0xb   : > { %p29_p4 = scmp.ge.s32.totalorder %s1015_s20, 2  ;;  %p105_p6 = scmp.eq.s32.totalorder %s478_s18, 3 }
   0xc   : > { %p481_p7 = scmp.ge.s32.totalorder %s780_s16, 1  ;;  %p141_p9 = scmp.lt.s32.totalorder %s780_s16, 5 }
   0xd   : > { %s1017_s20 = smov (%p29_p4, %s1015_s20), 0  ;;  %p861_p8 = por %p105_p6, %p104_p5 }
   0xe   : > { %s83_s24 = ssub.s32 %s776_s15, %s1017_s20  ;;  %s88_s25 = sadd.s32 1, %s760_s11 }
   0xf   : > { %s85_s26 = sor.u32 %s84_s21, %s83_s24  ;;  %p142_p10 = pnand %p481_p7, %p141_p9 }
  0x10   : > { %p86_p11 = scmp.eq.s32.totalorder %s85_s26, 0  ;;  %s485_s28 = sshll.u32 (!%p142_p10), %s764_s12, 4 }
  0x11   : > { %145 = sbr.rel (%p142_p10) target bundleno = 312 (0x138), region = 28  ;;  %s483_s29 = sshll.u32 (!%p142_p10), %s768_s13, 4 }
  0x12   : > { %s870_s27 = scalar_select %p86_p11, %s760_s11, %s88_s25  }
  0x13   : > { %p175_p12 = scmp.lt.s32.totalorder (!%p142_p10), %s485_s28, 31  ;;  %p169_p13 = scmp.lt.s32.totalorder (!%p142_p10), %s483_s29, 31 }
  0x14   : > { %s165_s18 = sand.u32 (!%p142_p10), 1, %s756_s10   ;;  %s493_s25 = sshll.u32 (!%p142_p10), %s768_s13, 5 }
  0x15   : > { %s482_s21 = sshll.u32 (!%p142_p10), %s165_s18, 7  ;;  %s387_s26 = sadd.s32 (!%p142_p10), %s764_s12, %s493_s25 }
  0x16   : > { %s1019_s28 = smov (!%p175_p12, %s485_s28), 31  ;;  %s1021_s29 = smov (!%p169_p13, %s483_s29), 31 }
  0x17   : > { %s486_s30 = sshll.u32 %s1019_s28, 3  ;;  %s484_s6 = sshll.u32 %s1021_s29, 3 }
  0x18   : > { %s877_s5 = scalar_lea.vmem %s1001_s1, %s486_s30  ;;  %s884_s17 = scalar_lea.vmem %s1000_s0, %s484_s6 }
  0x19   : > { %v212_v0 = vld [vmem:[%s877_s5 + $0x78] sm:$0xff]  ;;  %v211_v1 = vld [vmem:[%s877_s5 + $0x70] sm:$0xff]  ;;  %v210_v2 = vld [vmem:[%s877_s5 + $0x68] sm:$0xff]  ;;  %s919_s24 = scalar_lea.vmem [#allocation2], %s482_s21  ;;  %s490_s13 = sshll.u32 %s387_s26, 7 }
  0x1a   : > { %526 = vmatprep.subr.mxu0 %v212_v0  ;;  %582 = vmatprep.subr.mxu1 %v212_v0  ;;  %v181_v3 = vld [vmem:[%s884_s17] sm:$0xff]  ;;  %v208_v6 = vld [vmem:[%s877_s5 + $0x58] sm:$0xff]  ;;  %v207_v7 = vld [vmem:[%s877_s5 + $0x50] sm:$0xff]  ;;  %s390_s28 = sshll.u32 %s919_s24, 4  ;;  %s939_s30 = scalar_lea.hbm %s1002_s2, %s490_s13  ;;  %s941_s28 = int_to_ptr.vmem [resolvable:$true] %s390_s28 }
  0x1b   : > { %527 = vmatpush3.xpose.msra.mxu0 %v212_v0  ;;  %598 = vmatpush3.xpose.msra.mxu1 %v212_v0  ;;  %v189_v4 = vld [vmem:[%s884_s17 + $0x40] sm:$0xff]  ;;  %v206_v8 = vld [vmem:[%s877_s5 + $0x48] sm:$0xff]  ;;  %v204_v10 = vld [vmem:[%s877_s5 + $0x38] sm:$0xff]  ;;  %s949_s3 = scalar_lea.sflag [#allocation3], %s165_s18  ;;  %s688_s4 = scalar_lea.vmem %s941_s28, 2048 }
  0x1c   : > { %528 = vmatprep.subr.mxu0 %v211_v1  ;;  %583 = vmatprep.subr.mxu1 %v211_v1  ;;  %v209_v5 = vld [vmem:[%s877_s5 + $0x60] sm:$0xff]  ;;  %v203_v11 = vld [vmem:[%s877_s5 + $0x30] sm:$0xff]  ;;  %v202_v12 = vld [vmem:[%s877_s5 + $0x28] sm:$0xff]  ;;  %p689_p0 = scmp.ne.s32.totalorder %s941_s28, %s688_s4 }
  0x1d   : > { %558 = vmatprep.mubr.f32.mxu0 %v181_v3  ;;  %570 = vmatprep.mubr.f32.mxu1 %v189_v4  ;;  %v205_v9 = vld [vmem:[%s877_s5 + $0x40] sm:$0xff]  ;;  %v200_v14 = vld [vmem:[%s877_s5 + $0x18] sm:$0xff]  ;;  %v199_v15 = vld [vmem:[%s877_s5 + $0x10] sm:$0xff] }
  0x1e   : > { %v201_v13 = vld [vmem:[%s877_s5 + $0x20] sm:$0xff]  ;;  %v198_v16 = vld [vmem:[%s877_s5 + $0x8] sm:$0xff]  ;;  %v183_v20 = vld [vmem:[%s884_s17 + $0x10] sm:$0xff]  ;;  %p690_p1 = pnand %p689_p0, %p852_p3 }
  0x1f   : > { %529 = vmatpush3.xpose.msra.mxu0 %v211_v1  ;;  %599 = vmatpush3.xpose.msra.mxu1 %v211_v1  ;;  %v197_v17 = vld [vmem:[%s877_s5] sm:$0xff]  ;;  %v182_v18 = vld [vmem:[%s884_s17 + $0x8] sm:$0xff]  ;;  %v191_v21 = vld [vmem:[%s884_s17 + $0x50] sm:$0xff]  ;;  %s782_s5 = smov [#allocation2]  }
  0x20   : > { %530 = vmatprep.subr.mxu0 %v210_v2  ;;  %584 = vmatprep.subr.mxu1 %v210_v2  ;;  %v190_v19 = vld [vmem:[%s884_s17 + $0x48] sm:$0xff]  ;;  %v184_v22 = vld [vmem:[%s884_s17 + $0x18] sm:$0xff]  ;;  %v185_v24 = vld [vmem:[%s884_s17 + $0x20] sm:$0xff]  ;;  %p691_p2 = pneg %p690_p1  ;;  %s692_s6 = sshll.u32 %s782_s5, 4  ;;  %s693_s6 = int_to_ptr.vmem [resolvable:$false] %s692_s6 }
  0x21   : > { %v192_v23 = vld [vmem:[%s884_s17 + $0x58] sm:$0xff]  ;;  %v193_v25 = vld [vmem:[%s884_s17 + $0x60] sm:$0xff]  ;;  %v186_v26 = vld [vmem:[%s884_s17 + $0x28] sm:$0xff]  ;;  %s694_s7 = scalar_lea.vmem %s693_s6, 4096  ;;  %p695_p4 = scmp.lt.s32.totalorder %s941_s28, %s693_s6 }
  0x22   : > { %v194_v27 = vld [vmem:[%s884_s17 + $0x68] sm:$0xff]  ;;  %v187_v28 = vld [vmem:[%s884_s17 + $0x30] sm:$0xff]  ;;  %v188_v30 = vld [vmem:[%s884_s17 + $0x38] sm:$0xff]  ;;  %p696_p5 = scmp.lt.s32.totalorder %s694_s7, %s688_s4 }
  0x23   : > { %531 = vmatpush3.xpose.msra.mxu0 %v210_v2  ;;  %600 = vmatpush3.xpose.msra.mxu1 %v210_v2  ;;  %v195_v29 = vld [vmem:[%s884_s17 + $0x70] sm:$0xff]  ;;  %v196_v31 = vld [vmem:[%s884_s17 + $0x78] sm:$0xff] }
  0x24   : > { %532 = vmatprep.subr.mxu0 %v209_v5  ;;  %585 = vmatprep.subr.mxu1 %v209_v5  ;;  %p697_p6 = por %p696_p5, %p695_p4 }
  0x26   : > { %p698_p7 = pnand %p697_p6, %p691_p2 }
  0x27   : > { %533 = vmatpush3.xpose.msra.mxu0 %v209_v5  ;;  %601 = vmatpush3.xpose.msra.mxu1 %v209_v5 }
  0x28   : > { %534 = vmatprep.subr.mxu0 %v208_v6  ;;  %586 = vmatprep.subr.mxu1 %v208_v6 }
  0x2b   : > { %535 = vmatpush3.xpose.msra.mxu0 %v208_v6  ;;  %602 = vmatpush3.xpose.msra.mxu1 %v208_v6 }
  0x2c   : > { %536 = vmatprep.subr.mxu0 %v207_v7  ;;  %587 = vmatprep.subr.mxu1 %v207_v7 }
  0x2f   : > { %537 = vmatpush3.xpose.msra.mxu0 %v207_v7  ;;  %603 = vmatpush3.xpose.msra.mxu1 %v207_v7 }
  0x30   : > { %538 = vmatprep.subr.mxu0 %v206_v8  ;;  %588 = vmatprep.subr.mxu1 %v206_v8 }
  0x33   : > { %539 = vmatpush3.xpose.msra.mxu0 %v206_v8  ;;  %604 = vmatpush3.xpose.msra.mxu1 %v206_v8 }
  0x34   : > { %540 = vmatprep.subr.mxu0 %v205_v9  ;;  %589 = vmatprep.subr.mxu1 %v205_v9 }
  0x37   : > { %541 = vmatpush3.xpose.msra.mxu0 %v205_v9  ;;  %605 = vmatpush3.xpose.msra.mxu1 %v205_v9 }
  0x38   : > { %542 = vmatprep.subr.mxu0 %v204_v10  ;;  %590 = vmatprep.subr.mxu1 %v204_v10 }
  0x3b   : > { %543 = vmatpush3.xpose.msra.mxu0 %v204_v10  ;;  %606 = vmatpush3.xpose.msra.mxu1 %v204_v10 }
  0x3c   : > { %544 = vmatprep.subr.mxu0 %v203_v11  ;;  %591 = vmatprep.subr.mxu1 %v203_v11 }
  0x3f   : > { %545 = vmatpush3.xpose.msra.mxu0 %v203_v11  ;;  %607 = vmatpush3.xpose.msra.mxu1 %v203_v11 }
  0x40   : > { %546 = vmatprep.subr.mxu0 %v202_v12  ;;  %592 = vmatprep.subr.mxu1 %v202_v12 }
  0x43   : > { %547 = vmatpush3.xpose.msra.mxu0 %v202_v12  ;;  %608 = vmatpush3.xpose.msra.mxu1 %v202_v12 }
  0x44   : > { %548 = vmatprep.subr.mxu0 %v201_v13  ;;  %593 = vmatprep.subr.mxu1 %v201_v13 }
  0x47   : > { %549 = vmatpush3.xpose.msra.mxu0 %v201_v13  ;;  %609 = vmatpush3.xpose.msra.mxu1 %v201_v13 }
  0x48   : > { %550 = vmatprep.subr.mxu0 %v200_v14  ;;  %594 = vmatprep.subr.mxu1 %v200_v14 }
  0x4b   : > { %551 = vmatpush3.xpose.msra.mxu0 %v200_v14  ;;  %610 = vmatpush3.xpose.msra.mxu1 %v200_v14 }
  0x4c   : > { %552 = vmatprep.subr.mxu0 %v199_v15  ;;  %595 = vmatprep.subr.mxu1 %v199_v15 }
  0x4f   : > { %553 = vmatpush3.xpose.msra.mxu0 %v199_v15  ;;  %611 = vmatpush3.xpose.msra.mxu1 %v199_v15 }
  0x50   : > { %554 = vmatprep.subr.mxu0 %v198_v16  ;;  %596 = vmatprep.subr.mxu1 %v198_v16 }
  0x53   : > { %555 = vmatpush3.xpose.msra.mxu0 %v198_v16  ;;  %612 = vmatpush3.xpose.msra.mxu1 %v198_v16 }
  0x54   : > { %556 = vmatprep.subr.mxu0 %v197_v17  ;;  %597 = vmatprep.subr.mxu1 %v197_v17 }
  0x57   : > { %557 = vmatpush3.xpose.msra.mxu0 %v197_v17  ;;  %613 = vmatpush3.xpose.msra.mxu1 %v197_v17 }
  0x5a   : > { %559 = vmatmul.mubr.f32.vlgmr.msra.gmra.mxu0 %v182_v18  ;;  %571 = vmatmul.mubr.f32.vlgmr.msra.gmra.mxu1 %v190_v19 }
  0x5b   : > { %561 = vmatprep.mubr.f32.mxu0 %v183_v20  ;;  %573 = vmatprep.mubr.f32.mxu1 %v191_v21 }
  0x5e   : > { %562 = vmatmul.mubr.f32.gmra.mxu0 %v184_v22  ;;  %574 = vmatmul.mubr.f32.gmra.mxu1 %v192_v23 }
  0x5f   : > { %564 = vmatprep.mubr.f32.mxu0 %v185_v24  ;;  %576 = vmatprep.mubr.f32.mxu1 %v193_v25 }
  0x62   : > { %565 = vmatmul.mubr.f32.gmra.mxu0 %v186_v26  ;;  %577 = vmatmul.mubr.f32.gmra.mxu1 %v194_v27 }
  0x63   : > { %567 = vmatprep.mubr.f32.mxu0 %v187_v28  ;;  %579 = vmatprep.mubr.f32.mxu1 %v195_v29 }
  0x66   : > { %568 = vmatmul.mubr.f32.gmra.mxu0 %v188_v30  ;;  %580 = vmatmul.mubr.f32.gmra.mxu1 %v196_v31 }
 0x11a   : > { %v560_v32 = vpop.f32.mrf.mxu0  ;;  %v572_v33 = vpop.f32.mrf.mxu1 }
 0x11b   : > { %359 = vst [vmem:[%s919_s24 + $0x8] sm:$0xff] %v560_v32  ;;  %367 = vst [vmem:[%s919_s24 + $0x48] sm:$0xff] %v572_v33 }
 0x11c   : > { %v279_v34 = vpop.f32.mrf.mxu0  ;;  %v319_v35 = vpop.f32.mrf.mxu1 }
 0x11d   : > { %358 = vst [vmem:[%s919_s24] sm:$0xff] %v279_v34  ;;  %366 = vst [vmem:[%s919_s24 + $0x40] sm:$0xff] %v319_v35 }
 0x11e   : > { %v563_v36 = vpop.f32.mrf.mxu0  ;;  %v575_v37 = vpop.f32.mrf.mxu1 }
 0x11f   : > { %361 = vst [vmem:[%s919_s24 + $0x18] sm:$0xff] %v563_v36  ;;  %369 = vst [vmem:[%s919_s24 + $0x58] sm:$0xff] %v575_v37 }
 0x120   : > { %v289_v38 = vpop.f32.mrf.mxu0  ;;  %v329_v39 = vpop.f32.mrf.mxu1 }
 0x121   : > { %360 = vst [vmem:[%s919_s24 + $0x10] sm:$0xff] %v289_v38  ;;  %368 = vst [vmem:[%s919_s24 + $0x50] sm:$0xff] %v329_v39 }
 0x122   : > { %v566_v40 = vpop.f32.mrf.mxu0  ;;  %v578_v41 = vpop.f32.mrf.mxu1 }
 0x123   : > { %363 = vst [vmem:[%s919_s24 + $0x28] sm:$0xff] %v566_v40  ;;  %371 = vst [vmem:[%s919_s24 + $0x68] sm:$0xff] %v578_v41 }
 0x124   : > { %v299_v42 = vpop.f32.mrf.mxu0  ;;  %v339_v43 = vpop.f32.mrf.mxu1 }
 0x125   : > { %362 = vst [vmem:[%s919_s24 + $0x20] sm:$0xff] %v299_v42  ;;  %370 = vst [vmem:[%s919_s24 + $0x60] sm:$0xff] %v339_v43 }
 0x126   : > { %v569_v44 = vpop.f32.mrf.mxu0  ;;  %v581_v45 = vpop.f32.mrf.mxu1 }
 0x127   : > { %365 = vst [vmem:[%s919_s24 + $0x38] sm:$0xff] %v569_v44  ;;  %373 = vst [vmem:[%s919_s24 + $0x78] sm:$0xff] %v581_v45 }
 0x128   : > { %v309_v46 = vpop.f32.mrf.mxu0  ;;  %v349_v47 = vpop.f32.mrf.mxu1 }
 0x129   : > { %364 = vst [vmem:[%s919_s24 + $0x30] sm:$0xff] %v309_v46  ;;  %372 = vst [vmem:[%s919_s24 + $0x70] sm:$0xff] %v349_v47 }
 0x12a   : > { %701 = shalt.err (!%p698_p7)
}
 0x12b   : > { %s702_s8 = scalar_lea.hbm %s939_s30, 2048  ;;  %s706_s21 = scalar_lea.hbm %s1002_s2, 8192 }
 0x12c   : > { %p703_p9 = scmp.ne.s32.totalorder %s939_s30, %s702_s8  ;;  %p707_p12 = scmp.lt.s32.totalorder %s939_s30, %s1002_s2 }
 0x12d   : > { %p708_p13 = scmp.lt.s32.totalorder %s706_s21, %s702_s8 }
 0x12e   : > { %p704_p10 = pnand %p703_p9, %p852_p3 }
 0x12f   : > { %p709_p0 = por %p708_p13, %p707_p12 }
 0x130   : > { %p705_p11 = pneg %p704_p10 }
 0x132   : > { %p710_p1 = pnand %p709_p0, %p705_p11 }
 0x134   : > { %713 = shalt.err (!%p710_p1)
}
 0x135   : > { %s783_s26 = smov 128   ;;  %s784_s13 = smov 256  }
 0x136   : > { %s785_s12 = smov 8  }
 0x137   : > { %614 = dma.vmem_to_hbm [thread:$0]  (%p852_p3), %s941_s28, 2048, %s939_s30, %s949_s3, %s783_s26, %s784_s13, %s785_s12  }
 0x138 PF: > { %p620_p2 = scmp.ge.s32.totalorder %s780_s16, 2  ;;  %s405_s29 = sand.u32 1, %s752_s9  }
 0x139   : > { %s406_s4 = scalar_lea.sflag [#allocation3], %s405_s29 }
 0x13a   : > { %p617_p4 = pnand %p620_p2, %p861_p8 }
 0x13c   : > { %p618_p5 = pneg %p617_p4 }
 0x13e   : > { %747 = dma.done.wait (%p618_p5), %s406_s4, 2048  }
 0x13f   : > { %749 = vsyncadd (%p618_p5), %s406_s4, 4294965248  ;;  %s15_s16 = sadd.s32 1, %s780_s16   ;;  %s1005_s9 = smov %s756_s10 }
 0x140   : > { %p12_p6 = scmp.ge.s32.totalorder %s15_s16, 6   ;;  %s1006_s10 = smov %s760_s11 }
 0x141   : > { %s1007_s11 = smov %s870_s27  ;;  %s1008_s12 = smov %s772_s14 }
 0x142   : > { %s1009_s13 = smov %s776_s15  ;;  %s1010_s14 = smov %s1013_s19 }
 0x143   : > { %s1011_s15 = smov %s1017_s20  ;;  %14 = sbr.rel (!%p12_p6) target bundleno = 5 (0x5), region = 66 }
 0x148   :  { %411 = vsyncpa [#allocation3], 1 }
 0x149   :  { %413 = vsyncpa [#allocation3 + $0x1], 1 }

// kernel: maped_inner_product_decoder.2
= control target key start
LH: loop header
LB: loop body
LE: loop exit
PB: predicated region body
PF: predicated region fallthrough
CT: control target
= control target key end

     0   :  { %s1055_s18 = smov 0   ;;  %s1367_s0 = inlined_call_operand.vmem [shape: f32[256,32], index: 0, kind: input, shape index: {}]   ;;  %s1368_s1 = inlined_call_operand.vmem [shape: f32[32,192], index: 1, kind: input, shape index: {}]   ;;  %s1369_s2 = inlined_call_operand.vmem [shape: f32[192,128], index: 2, kind: input, shape index: {}]   ;;  %s1370_s3 = inlined_call_operand.vmem [shape: f32[1,192], index: 3, kind: input, shape index: {}]   ;;  %s1371_s4 = inlined_call_operand.vmem [shape: f32[1,128], index: 4, kind: input, shape index: {}]   ;;  %s1372_s5 = inlined_call_operand.vmem [shape: f32[256,128], index: 5, kind: output, shape index: {}]  }
   0x1 LB: > { %s819_s19 = sadd.s32 4294967295, %s1022_s18   ;;  %p823_p0 = scmp.ge.s32.totalorder %s1022_s18, 1  ;;  %s1022_s18 = sphi %s1055_s18, %s15_s18  }
   0x2   : > { %p188_p1 = scmp.lt.s32.totalorder %s1022_s18, 3 }
   0x4   : > { %p189_p2 = pnand %p823_p0, %p188_p1 }
   0x5   : > { %s824_s26 = sshll.u32 (!%p189_p2), %s819_s19, 4 }
   0x6   : > { %192 = sbr.rel (%p189_p2) target bundleno = 502 (0x1f6), region = 40  ;;  %p217_p3 = scmp.lt.s32.totalorder (!%p189_p2), %s824_s26, 31 }
   0xb   : > { %v251_v0 = vld [vmem:[%s1368_s1 + $0x38] sm:$0xff]  ;;  %v250_v1 = vld [vmem:[%s1368_s1 + $0x30] sm:$0xff]  ;;  %v249_v2 = vld [vmem:[%s1368_s1 + $0x28] sm:$0xff]  ;;  %v1024_v4 = vmov 0.0   ;;  %s1374_s26 = smov (!%p217_p3, %s824_s26), 31  ;;  %vm264_vm0 = vcmask 261120   ;;  %v254_v49 = vlaneseq }
   0xc   : > { %337 = vmatprep.subr.mxu0 %v251_v0  ;;  %v248_v3 = vld [vmem:[%s1368_s1 + $0x20] sm:$0xff]  ;;  %377 = vmatprep.mubr.f32.mxu0 %v1024_v4  ;;  %v247_v5 = vld [vmem:[%s1368_s1 + $0x18] sm:$0xff]  ;;  %v246_v7 = vld [vmem:[%s1368_s1 + $0x10] sm:$0xff]  ;;  %s825_s16 = sshll.u32 %s1374_s26, 3  ;;  %vm537_vm1 = vcmask 523264  }
   0xd   : > { %338 = vmatpush1.msra.mxu0 %v250_v1  ;;  %v521_v6 = vld [vmem:[%s1369_s2 + $0x78] sm:$0xff]  ;;  %863 = vmatprep.subr.mxu1 %v1024_v4  ;;  %v245_v8 = vld [vmem:[%s1368_s1 + $0x8] sm:$0xff]  ;;  %v520_v9 = vld [vmem:[%s1369_s2 + $0x70] sm:$0xff]  ;;  %s1104_s20 = scalar_lea.vmem %s1367_s0, %s825_s16  ;;  %v255_v50 = vshrl.u32 %v254_v49, 7 }
   0xe   : > { %339 = vmatprep.subr.mxu0 %v249_v2  ;;  %887 = vmatpush1.msra.mxu1 %v521_v6  ;;  %v244_v10 = vld [vmem:[%s1368_s1] sm:$0xff]  ;;  %v519_v11 = vld [vmem:[%s1369_s2 + $0x68] sm:$0xff]  ;;  %v230_v15 = vld [vmem:[%s1104_s20 + $0x10] sm:$0xff] }
   0xf   : > { %340 = vmatpush1.msra.mxu0 %v248_v3  ;;  %864 = vmatprep.subr.mxu1 %v1024_v4  ;;  %v228_v12 = vld [vmem:[%s1104_s20] sm:$0xff]  ;;  %v229_v13 = vld [vmem:[%s1104_s20 + $0x8] sm:$0xff]  ;;  %v517_v16 = vld [vmem:[%s1369_s2 + $0x58] sm:$0xff]  ;;  %v256_v51 = vsub.s32 0, %v255_v50  ;;  %v260_v53 = vsub.s32 1, %v255_v50 }
  0x10   : > { %341 = vmatprep.subr.mxu0 %v247_v5  ;;  %888 = vmatpush1.msra.mxu1 %v520_v9  ;;  %v518_v14 = vld [vmem:[%s1369_s2 + $0x60] sm:$0xff]  ;;  %v516_v17 = vld [vmem:[%s1369_s2 + $0x50] sm:$0xff]  ;;  %v231_v18 = vld [vmem:[%s1104_s20 + $0x18] sm:$0xff] }
  0x11   : > { %342 = vmatpush1.msra.mxu0 %v246_v7  ;;  %865 = vmatprep.subr.mxu1 %v1024_v4  ;;  %v515_v19 = vld [vmem:[%s1369_s2 + $0x48] sm:$0xff]  ;;  %v514_v20 = vld [vmem:[%s1369_s2 + $0x40] sm:$0xff]  ;;  %v513_v22 = vld [vmem:[%s1369_s2 + $0x38] sm:$0xff] }
  0x12   : > { %343 = vmatprep.subr.mxu0 %v245_v8  ;;  %889 = vmatpush1.msra.mxu1 %v519_v11  ;;  %v232_v21 = vld [vmem:[%s1104_s20 + $0x20] sm:$0xff]  ;;  %v512_v23 = vld [vmem:[%s1369_s2 + $0x30] sm:$0xff]  ;;  %v233_v24 = vld [vmem:[%s1104_s20 + $0x28] sm:$0xff] }
  0x13   : > { %344 = vmatpush1.msra.mxu0 %v244_v10  ;;  %866 = vmatprep.subr.mxu1 %v1024_v4  ;;  %v511_v25 = vld [vmem:[%s1369_s2 + $0x28] sm:$0xff]  ;;  %v510_v26 = vld [vmem:[%s1369_s2 + $0x20] sm:$0xff]  ;;  %v234_v27 = vld [vmem:[%s1104_s20 + $0x30] sm:$0xff] }
  0x14   : > { %828 = vmatmul.mubr.msk.f32.vlgmr.msra.gmra.mxu0 %vm264_vm0, %v228_v12  ;;  %586 = vmatprep.subr.mxu0 %v1024_v4  ;;  %v509_v28 = vld [vmem:[%s1369_s2 + $0x18] sm:$0xff]  ;;  %v508_v29 = vld [vmem:[%s1369_s2 + $0x10] sm:$0xff]  ;;  %v236_v31 = vld [vmem:[%s1104_s20 + $0x40] sm:$0xff] }
  0x15   : > { %383 = vmatprep.mubr.f32.mxu0 %v1024_v4  ;;  %587 = vmatpush1.msra.mxu0 %v521_v6  ;;  %v235_v30 = vld [vmem:[%s1104_s20 + $0x38] sm:$0xff]  ;;  %v237_v32 = vld [vmem:[%s1104_s20 + $0x48] sm:$0xff]  ;;  %v238_v33 = vld [vmem:[%s1104_s20 + $0x50] sm:$0xff] }
  0x16   : > { %588 = vmatprep.subr.mxu0 %v1024_v4  ;;  %890 = vmatpush1.msra.mxu1 %v518_v14  ;;  %v239_v34 = vld [vmem:[%s1104_s20 + $0x58] sm:$0xff]  ;;  %v240_v35 = vld [vmem:[%s1104_s20 + $0x60] sm:$0xff]  ;;  %v241_v36 = vld [vmem:[%s1104_s20 + $0x68] sm:$0xff] }
  0x17   : > { %589 = vmatpush1.msra.mxu0 %v520_v9  ;;  %867 = vmatprep.subr.mxu1 %v1024_v4  ;;  %v242_v37 = vld [vmem:[%s1104_s20 + $0x70] sm:$0xff]  ;;  %v243_v38 = vld [vmem:[%s1104_s20 + $0x78] sm:$0xff]  ;;  %v507_v39 = vld [vmem:[%s1369_s2 + $0x8] sm:$0xff]  ;;  %s1334_s20 = scalar_lea.vmem %s1372_s5, %s825_s16 }
  0x18   : > { %829 = vmatmul.mubr.msk.f32.gmra.mxu0 %vm264_vm0, %v229_v13  ;;  %590 = vmatprep.subr.mxu0 %v1024_v4  ;;  %v506_v40 = vld [vmem:[%s1369_s2] sm:$0xff]  ;;  %v529_v41 = vld [vmem:[%s1369_s2 + $0xb8] sm:$0xff]  ;;  %v528_v42 = vld [vmem:[%s1369_s2 + $0xb0] sm:$0xff] }
  0x19   : > { %389 = vmatprep.mubr.f32.mxu0 %v1024_v4  ;;  %591 = vmatpush1.msra.mxu0 %v519_v11  ;;  %v527_v43 = vld [vmem:[%s1369_s2 + $0xa8] sm:$0xff]  ;;  %v526_v44 = vld [vmem:[%s1369_s2 + $0xa0] sm:$0xff]  ;;  %v525_v45 = vld [vmem:[%s1369_s2 + $0x98] sm:$0xff] }
  0x1a   : > { %592 = vmatprep.subr.mxu0 %v1024_v4  ;;  %891 = vmatpush1.msra.mxu1 %v517_v16  ;;  %v524_v46 = vld [vmem:[%s1369_s2 + $0x90] sm:$0xff]  ;;  %v523_v47 = vld [vmem:[%s1369_s2 + $0x88] sm:$0xff]  ;;  %v522_v48 = vld [vmem:[%s1369_s2 + $0x80] sm:$0xff] }
  0x1b   : > { %593 = vmatpush1.msra.mxu0 %v518_v14  ;;  %868 = vmatprep.subr.mxu1 %v1024_v4  ;;  %v252_v52 = vld [vmem:[%s1370_s3] sm:$0x3] }
  0x1c   : > { %830 = vmatmul.mubr.msk.f32.gmra.mxu0 %vm264_vm0, %v230_v15  ;;  %594 = vmatprep.subr.mxu0 %v1024_v4  ;;  %v1268_v54 = vrot.slane %v252_v52, %v256_v51  ;;  %v1270_v55 = vrot.slane %v252_v52, %v260_v53 }
  0x1d   : > { %395 = vmatprep.mubr.f32.mxu0 %v1024_v4  ;;  %595 = vmatpush1.msra.mxu0 %v517_v16 }
  0x1e   : > { %596 = vmatprep.subr.mxu0 %v1024_v4  ;;  %892 = vmatpush1.msra.mxu1 %v516_v17 }
  0x1f   : > { %597 = vmatpush1.msra.mxu0 %v516_v17  ;;  %869 = vmatprep.subr.mxu1 %v1024_v4 }
  0x20   : > { %831 = vmatmul.mubr.msk.f32.gmra.mxu0 %vm264_vm0, %v231_v18  ;;  %598 = vmatprep.subr.mxu0 %v1024_v4 }
  0x21   : > { %401 = vmatprep.mubr.f32.mxu0 %v1024_v4  ;;  %599 = vmatpush1.msra.mxu0 %v515_v19 }
  0x22   : > { %600 = vmatprep.subr.mxu0 %v1024_v4  ;;  %893 = vmatpush1.msra.mxu1 %v515_v19 }
  0x23   : > { %601 = vmatpush1.msra.mxu0 %v514_v20  ;;  %870 = vmatprep.subr.mxu1 %v1024_v4 }
  0x24   : > { %832 = vmatmul.mubr.msk.f32.gmra.mxu0 %vm264_vm0, %v232_v21  ;;  %602 = vmatprep.subr.mxu0 %v1024_v4 }
  0x25   : > { %407 = vmatprep.mubr.f32.mxu0 %v1024_v4  ;;  %603 = vmatpush1.msra.mxu0 %v513_v22 }
  0x26   : > { %604 = vmatprep.subr.mxu0 %v1024_v4  ;;  %894 = vmatpush1.msra.mxu1 %v514_v20 }
  0x27   : > { %605 = vmatpush1.msra.mxu0 %v512_v23  ;;  %871 = vmatprep.subr.mxu1 %v1024_v4 }
  0x28   : > { %833 = vmatmul.mubr.msk.f32.gmra.mxu0 %vm264_vm0, %v233_v24  ;;  %606 = vmatprep.subr.mxu0 %v1024_v4 }
  0x29   : > { %413 = vmatprep.mubr.f32.mxu0 %v1024_v4  ;;  %607 = vmatpush1.msra.mxu0 %v511_v25 }
  0x2a   : > { %608 = vmatprep.subr.mxu0 %v1024_v4  ;;  %895 = vmatpush1.msra.mxu1 %v513_v22 }
  0x2b   : > { %609 = vmatpush1.msra.mxu0 %v510_v26  ;;  %872 = vmatprep.subr.mxu1 %v1024_v4 }
  0x2c   : > { %834 = vmatmul.mubr.msk.f32.gmra.mxu0 %vm264_vm0, %v234_v27  ;;  %610 = vmatprep.subr.mxu0 %v1024_v4 }
  0x2d   : > { %419 = vmatprep.mubr.f32.mxu0 %v1024_v4  ;;  %611 = vmatpush1.msra.mxu0 %v509_v28 }
  0x2e   : > { %612 = vmatprep.subr.mxu0 %v1024_v4  ;;  %896 = vmatpush1.msra.mxu1 %v512_v23 }
  0x2f   : > { %613 = vmatpush1.msra.mxu0 %v508_v29  ;;  %873 = vmatprep.subr.mxu1 %v1024_v4 }
  0x30   : > { %835 = vmatmul.mubr.msk.f32.gmra.mxu0 %vm264_vm0, %v235_v30  ;;  %614 = vmatprep.subr.mxu0 %v1024_v4 }
  0x31   : > { %425 = vmatprep.mubr.f32.mxu0 %v1024_v4  ;;  %897 = vmatpush1.msra.mxu1 %v511_v25 }
  0x32   : > { %874 = vmatprep.subr.mxu1 %v1024_v4  ;;  %615 = vmatpush1.msra.mxu0 %v507_v39 }
  0x33   : > { %898 = vmatpush1.msra.mxu1 %v510_v26  ;;  %616 = vmatprep.subr.mxu0 %v1024_v4 }
  0x34   : > { %836 = vmatmul.mubr.msk.f32.gmra.mxu0 %vm264_vm0, %v236_v31  ;;  %875 = vmatprep.subr.mxu1 %v1024_v4 }
  0x35   : > { %431 = vmatprep.mubr.f32.mxu0 %v1024_v4  ;;  %899 = vmatpush1.msra.mxu1 %v509_v28 }
  0x36   : > { %876 = vmatprep.subr.mxu1 %v1024_v4  ;;  %617 = vmatpush1.msra.mxu0 %v506_v40 }
  0x37   : > { %900 = vmatpush1.msra.mxu1 %v508_v29  ;;  %634 = vmatprep.subr.mxu0 %v1024_v4 }
  0x38   : > { %837 = vmatmul.mubr.msk.f32.gmra.mxu0 %vm264_vm0, %v237_v32  ;;  %877 = vmatprep.subr.mxu1 %v1024_v4 }
  0x39   : > { %437 = vmatprep.mubr.f32.mxu0 %v1024_v4  ;;  %901 = vmatpush1.msra.mxu1 %v507_v39 }
  0x3a   : > { %878 = vmatprep.subr.mxu1 %v1024_v4  ;;  %635 = vmatpush2.msra.mxu0 %v529_v41 }
  0x3b   : > { %902 = vmatpush1.msra.mxu1 %v506_v40  ;;  %636 = vmatprep.subr.mxu0 %v1024_v4 }
  0x3c   : > { %838 = vmatmul.mubr.msk.f32.gmra.mxu0 %vm264_vm0, %v238_v33  ;;  %879 = vmatprep.subr.mxu1 %v1024_v4 }
  0x3d   : > { %443 = vmatprep.mubr.f32.mxu0 %v1024_v4  ;;  %903 = vmatpush2.msra.mxu1 %v529_v41 }
  0x3e   : > { %880 = vmatprep.subr.mxu1 %v1024_v4  ;;  %637 = vmatpush2.msra.mxu0 %v528_v42 }
  0x3f   : > { %904 = vmatpush2.msra.mxu1 %v528_v42  ;;  %638 = vmatprep.subr.mxu0 %v1024_v4 }
  0x40   : > { %839 = vmatmul.mubr.msk.f32.gmra.mxu0 %vm264_vm0, %v239_v34  ;;  %881 = vmatprep.subr.mxu1 %v1024_v4 }
  0x41   : > { %449 = vmatprep.mubr.f32.mxu0 %v1024_v4  ;;  %639 = vmatpush2.msra.mxu0 %v527_v43 }
  0x42   : > { %905 = vmatpush2.msra.mxu1 %v527_v43  ;;  %640 = vmatprep.subr.mxu0 %v1024_v4 }
  0x43   : > { %882 = vmatprep.subr.mxu1 %v1024_v4  ;;  %641 = vmatpush2.msra.mxu0 %v526_v44 }
  0x44   : > { %840 = vmatmul.mubr.msk.f32.gmra.mxu0 %vm264_vm0, %v240_v35  ;;  %906 = vmatpush2.msra.mxu1 %v526_v44 }
  0x45   : > { %455 = vmatprep.mubr.f32.mxu0 %v1024_v4  ;;  %642 = vmatprep.subr.mxu0 %v1024_v4 }
  0x46   : > { %883 = vmatprep.subr.mxu1 %v1024_v4  ;;  %643 = vmatpush2.msra.mxu0 %v525_v45 }
  0x47   : > { %907 = vmatpush2.msra.mxu1 %v525_v45  ;;  %644 = vmatprep.subr.mxu0 %v1024_v4 }
  0x48   : > { %841 = vmatmul.mubr.msk.f32.gmra.mxu0 %vm264_vm0, %v241_v36  ;;  %884 = vmatprep.subr.mxu1 %v1024_v4 }
  0x49   : > { %461 = vmatprep.mubr.f32.mxu0 %v1024_v4  ;;  %645 = vmatpush2.msra.mxu0 %v524_v46 }
  0x4a   : > { %908 = vmatpush2.msra.mxu1 %v524_v46  ;;  %646 = vmatprep.subr.mxu0 %v1024_v4 }
  0x4b   : > { %885 = vmatprep.subr.mxu1 %v1024_v4  ;;  %647 = vmatpush2.msra.mxu0 %v523_v47 }
  0x4c   : > { %842 = vmatmul.mubr.msk.f32.gmra.mxu0 %vm264_vm0, %v242_v37  ;;  %909 = vmatpush2.msra.mxu1 %v523_v47 }
  0x4d   : > { %467 = vmatprep.mubr.f32.mxu0 %v1024_v4  ;;  %648 = vmatprep.subr.mxu0 %v1024_v4 }
  0x4e   : > { %886 = vmatprep.subr.mxu1 %v1024_v4  ;;  %649 = vmatpush2.msra.mxu0 %v522_v48 }
  0x4f   : > { %910 = vmatpush2.msra.mxu1 %v522_v48 }
  0x50   : > { %843 = vmatmul.mubr.msk.f32.gmra.mxu0 %vm264_vm0, %v243_v38 }
  0xd4   : > { %v379_v56 = vpop.f32.mrf.mxu0 }
  0xd5   : > { %v380_v57 = vadd.f32 %v379_v56, %v1268_v54 }
  0xd6   : > { %v381_v58 = vpop.f32.mrf.mxu0 }
  0xd7   : > { %v382_v59 = vadd.f32 %v381_v58, %v1270_v55 }
  0xd8   : > { %v385_v60 = vpop.f32.mrf.mxu0 }
  0xd9   : > { %920 = vtanh.f32 %v382_v59  ;;  %v386_v61 = vadd.f32 %v385_v60, %v1268_v54 }
  0xda   : > { %922 = vtanh.f32 %v380_v57  ;;  %v387_v62 = vpop.f32.mrf.mxu0 }
  0xdb   : > { %v388_v63 = vadd.f32 %v387_v62, %v1270_v55 }
  0xdc   : > { %v391_v0 = vpop.f32.mrf.mxu0 }
  0xdd   : > { %924 = vtanh.f32 %v388_v63  ;;  %v392_v1 = vadd.f32 %v391_v0, %v1268_v54 }
  0xde   : > { %926 = vtanh.f32 %v386_v61  ;;  %v393_v2 = vpop.f32.mrf.mxu0 }
  0xdf   : > { %v394_v3 = vadd.f32 %v393_v2, %v1270_v55 }
  0xe0   : > { %v397_v4 = vpop.f32.mrf.mxu0 }
  0xe1   : > { %928 = vtanh.f32 %v394_v3  ;;  %v398_v5 = vadd.f32 %v397_v4, %v1268_v54 }
  0xe2   : > { %930 = vtanh.f32 %v392_v1  ;;  %v399_v6 = vpop.f32.mrf.mxu0 }
  0xe3   : > { %v400_v7 = vadd.f32 %v399_v6, %v1270_v55 }
  0xe4   : > { %v403_v8 = vpop.f32.mrf.mxu0 }
  0xe5   : > { %932 = vtanh.f32 %v400_v7  ;;  %v404_v10 = vadd.f32 %v403_v8, %v1268_v54 }
  0xe6   : > { %v921_v9 = vpop.eup %920  ;;  %934 = vtanh.f32 %v398_v5  ;;  %v405_v11 = vpop.f32.mrf.mxu0 }
  0xe7   : > { %v923_v12 = vpop.eup %922  ;;  %v406_v13 = vadd.f32 %v405_v11, %v1270_v55  ;;  %845 = vmatprep.mubr.msk.f32.mxu0 %vm537_vm1, %v921_v9 }
  0xe8   : > { %v409_v14 = vpop.f32.mrf.mxu0  ;;  %651 = vmatmul.mubr.f32.vlgmr.msra.gmra.mxu0 %v923_v12 }
  0xe9   : > { %936 = vtanh.f32 %v406_v13  ;;  %v410_v16 = vadd.f32 %v409_v14, %v1268_v54 }
  0xea   : > { %v925_v15 = vpop.eup %924  ;;  %938 = vtanh.f32 %v404_v10  ;;  %v411_v17 = vpop.f32.mrf.mxu0 }
  0xeb   : > { %v927_v18 = vpop.eup %926  ;;  %v412_v19 = vadd.f32 %v411_v17, %v1270_v55  ;;  %846 = vmatprep.mubr.msk.f32.mxu0 %vm537_vm1, %v925_v15 }
  0xec   : > { %v415_v20 = vpop.f32.mrf.mxu0  ;;  %656 = vmatmul.mubr.f32.gmra.mxu0 %v927_v18 }
  0xed   : > { %940 = vtanh.f32 %v412_v19  ;;  %v416_v22 = vadd.f32 %v415_v20, %v1268_v54 }
  0xee   : > { %v929_v21 = vpop.eup %928  ;;  %942 = vtanh.f32 %v410_v16  ;;  %v417_v23 = vpop.f32.mrf.mxu0 }
  0xef   : > { %v931_v24 = vpop.eup %930  ;;  %v418_v25 = vadd.f32 %v417_v23, %v1270_v55  ;;  %847 = vmatprep.mubr.msk.f32.mxu0 %vm537_vm1, %v929_v21 }
  0xf0   : > { %v421_v26 = vpop.f32.mrf.mxu0  ;;  %661 = vmatmul.mubr.f32.gmra.mxu0 %v931_v24  ;;  %v1323_v24 = vld [vmem:[%s1371_s4] ss:$0 sm:$0xff] }
  0xf1   : > { %944 = vtanh.f32 %v418_v25  ;;  %v422_v28 = vadd.f32 %v421_v26, %v1268_v54 }
  0xf2   : > { %v933_v27 = vpop.eup %932  ;;  %946 = vtanh.f32 %v416_v22  ;;  %v423_v29 = vpop.f32.mrf.mxu0 }
  0xf3   : > { %v935_v30 = vpop.eup %934  ;;  %v424_v31 = vadd.f32 %v423_v29, %v1270_v55  ;;  %848 = vmatprep.mubr.msk.f32.mxu0 %vm537_vm1, %v933_v27 }
  0xf4   : > { %v427_v32 = vpop.f32.mrf.mxu0  ;;  %666 = vmatmul.mubr.f32.gmra.mxu0 %v935_v30 }
  0xf5   : > { %948 = vtanh.f32 %v424_v31  ;;  %v428_v34 = vadd.f32 %v427_v32, %v1268_v54 }
  0xf6   : > { %v937_v33 = vpop.eup %936  ;;  %950 = vtanh.f32 %v422_v28  ;;  %v429_v35 = vpop.f32.mrf.mxu0 }
  0xf7   : > { %v939_v36 = vpop.eup %938  ;;  %v430_v37 = vadd.f32 %v429_v35, %v1270_v55  ;;  %849 = vmatprep.mubr.msk.f32.mxu0 %vm537_vm1, %v937_v33 }
  0xf8   : > { %v433_v38 = vpop.f32.mrf.mxu0  ;;  %671 = vmatmul.mubr.f32.gmra.mxu0 %v939_v36 }
  0xf9   : > { %952 = vtanh.f32 %v430_v37  ;;  %v434_v40 = vadd.f32 %v433_v38, %v1268_v54 }
  0xfa   : > { %v941_v39 = vpop.eup %940  ;;  %954 = vtanh.f32 %v428_v34  ;;  %v435_v41 = vpop.f32.mrf.mxu0 }
  0xfb   : > { %v943_v42 = vpop.eup %942  ;;  %v436_v43 = vadd.f32 %v435_v41, %v1270_v55  ;;  %850 = vmatprep.mubr.msk.f32.mxu1 %vm537_vm1, %v941_v39 }
  0xfc   : > { %v439_v44 = vpop.f32.mrf.mxu0  ;;  %676 = vmatmul.mubr.f32.vlgmr.msra.gmra.mxu1 %v943_v42 }
  0xfd   : > { %956 = vtanh.f32 %v436_v43  ;;  %v440_v46 = vadd.f32 %v439_v44, %v1268_v54 }
  0xfe   : > { %v945_v45 = vpop.eup %944  ;;  %958 = vtanh.f32 %v434_v40  ;;  %v441_v47 = vpop.f32.mrf.mxu0 }
  0xff   : > { %v947_v48 = vpop.eup %946  ;;  %v442_v49 = vadd.f32 %v441_v47, %v1270_v55  ;;  %851 = vmatprep.mubr.msk.f32.mxu1 %vm537_vm1, %v945_v45 }
 0x100   : > { %v445_v50 = vpop.f32.mrf.mxu0  ;;  %681 = vmatmul.mubr.f32.gmra.mxu1 %v947_v48 }
 0x101   : > { %960 = vtanh.f32 %v442_v49  ;;  %v446_v52 = vadd.f32 %v445_v50, %v1268_v54 }
 0x102   : > { %v949_v51 = vpop.eup %948  ;;  %962 = vtanh.f32 %v440_v46  ;;  %v447_v53 = vpop.f32.mrf.mxu0 }
 0x103   : > { %v951_v56 = vpop.eup %950  ;;  %v448_v57 = vadd.f32 %v447_v53, %v1270_v55  ;;  %852 = vmatprep.mubr.msk.f32.mxu1 %vm537_vm1, %v949_v51 }
 0x104   : > { %v451_v58 = vpop.f32.mrf.mxu0  ;;  %686 = vmatmul.mubr.f32.gmra.mxu1 %v951_v56 }
 0x105   : > { %964 = vtanh.f32 %v448_v57  ;;  %v452_v60 = vadd.f32 %v451_v58, %v1268_v54 }
 0x106   : > { %v953_v59 = vpop.eup %952  ;;  %966 = vtanh.f32 %v446_v52  ;;  %v453_v61 = vpop.f32.mrf.mxu0 }
 0x107   : > { %v955_v62 = vpop.eup %954  ;;  %v454_v63 = vadd.f32 %v453_v61, %v1270_v55  ;;  %853 = vmatprep.mubr.msk.f32.mxu1 %vm537_vm1, %v953_v59 }
 0x108   : > { %v457_v0 = vpop.f32.mrf.mxu0  ;;  %691 = vmatmul.mubr.f32.gmra.mxu1 %v955_v62 }
 0x109   : > { %968 = vtanh.f32 %v454_v63  ;;  %v458_v2 = vadd.f32 %v457_v0, %v1268_v54 }
 0x10a   : > { %v957_v1 = vpop.eup %956  ;;  %970 = vtanh.f32 %v452_v60  ;;  %v459_v3 = vpop.f32.mrf.mxu0 }
 0x10b   : > { %v959_v4 = vpop.eup %958  ;;  %v460_v5 = vadd.f32 %v459_v3, %v1270_v55  ;;  %854 = vmatprep.mubr.msk.f32.mxu1 %vm537_vm1, %v957_v1 }
 0x10c   : > { %v463_v6 = vpop.f32.mrf.mxu0  ;;  %696 = vmatmul.mubr.f32.gmra.mxu1 %v959_v4 }
 0x10d   : > { %972 = vtanh.f32 %v460_v5  ;;  %v464_v8 = vadd.f32 %v463_v6, %v1268_v54 }
 0x10e   : > { %v961_v7 = vpop.eup %960  ;;  %974 = vtanh.f32 %v458_v2  ;;  %v465_v9 = vpop.f32.mrf.mxu0 }
 0x10f   : > { %v963_v10 = vpop.eup %962  ;;  %v466_v11 = vadd.f32 %v465_v9, %v1270_v55  ;;  %855 = vmatprep.mubr.msk.f32.mxu1 %vm537_vm1, %v961_v7 }
 0x110   : > { %v469_v12 = vpop.f32.mrf.mxu0  ;;  %701 = vmatmul.mubr.f32.gmra.mxu1 %v963_v10 }
 0x111   : > { %976 = vtanh.f32 %v466_v11  ;;  %v470_v14 = vadd.f32 %v469_v12, %v1268_v54 }
 0x112   : > { %v965_v13 = vpop.eup %964  ;;  %978 = vtanh.f32 %v464_v8  ;;  %v471_v15 = vpop.f32.mrf.mxu0 }
 0x113   : > { %v967_v16 = vpop.eup %966  ;;  %v472_v17 = vadd.f32 %v471_v15, %v1270_v55  ;;  %856 = vmatprep.mubr.msk.f32.mxu1 %vm537_vm1, %v965_v13 }
 0x114   : > { %706 = vmatmul.mubr.f32.gmra.mxu1 %v967_v16 }
 0x115   : > { %980 = vtanh.f32 %v472_v17 }
 0x116   : > { %v969_v18 = vpop.eup %968  ;;  %982 = vtanh.f32 %v470_v14 }
 0x117   : > { %v971_v19 = vpop.eup %970  ;;  %857 = vmatprep.mubr.msk.f32.mxu1 %vm537_vm1, %v969_v18 }
 0x118   : > { %711 = vmatmul.mubr.f32.gmra.mxu1 %v971_v19 }
 0x11a   : > { %v973_v20 = vpop.eup %972 }
 0x11b   : > { %v975_v21 = vpop.eup %974  ;;  %858 = vmatprep.mubr.msk.f32.mxu1 %vm537_vm1, %v973_v20 }
 0x11c   : > { %716 = vmatmul.mubr.f32.gmra.mxu1 %v975_v21 }
 0x11e   : > { %v977_v54 = vpop.eup %976 }
 0x11f   : > { %v979_v22 = vpop.eup %978  ;;  %859 = vmatprep.mubr.msk.f32.mxu1 %vm537_vm1, %v977_v54 }
 0x120   : > { %721 = vmatmul.mubr.f32.gmra.mxu1 %v979_v22 }
 0x122   : > { %v981_v55 = vpop.eup %980 }
 0x123   : > { %v983_v23 = vpop.eup %982  ;;  %860 = vmatprep.mubr.msk.f32.mxu1 %vm537_vm1, %v981_v55 }
 0x124   : > { %726 = vmatmul.mubr.f32.gmra.mxu1 %v983_v23 }
 0x1a8   : > { %v652_v25 = vpop.f32.mrf.mxu0 }
 0x1a9   : > { %v653_v26 = vadd.f32 %v1323_v24, %v652_v25 }
 0x1aa   : > { %v654_v27 = vpop.f32.mrf.mxu0 }
 0x1ab   : > { %984 = vtanh.f32 %v653_v26 }
 0x1ac   : > { %v657_v28 = vpop.f32.mrf.mxu0 }
 0x1ad   : > { %v658_v29 = vadd.f32 %v1323_v24, %v657_v28 }
 0x1ae   : > { %v659_v30 = vpop.f32.mrf.mxu0 }
 0x1af   : > { %986 = vtanh.f32 %v658_v29 }
 0x1b0   : > { %v662_v31 = vpop.f32.mrf.mxu0 }
 0x1b1   : > { %v663_v32 = vadd.f32 %v1323_v24, %v662_v31 }
 0x1b2   : > { %v664_v33 = vpop.f32.mrf.mxu0 }
 0x1b3   : > { %988 = vtanh.f32 %v663_v32 }
 0x1b4   : > { %v667_v34 = vpop.f32.mrf.mxu0 }
 0x1b5   : > { %v668_v35 = vadd.f32 %v1323_v24, %v667_v34 }
 0x1b6   : > { %v669_v36 = vpop.f32.mrf.mxu0 }
 0x1b7   : > { %990 = vtanh.f32 %v668_v35 }
 0x1b8   : > { %v985_v37 = vpop.eup %984  ;;  %v672_v38 = vpop.f32.mrf.mxu0 }
 0x1b9   : > { %747 = vst [vmem:[%s1334_s20] sm:$0xff] %v985_v37  ;;  %v673_v39 = vadd.f32 %v1323_v24, %v672_v38 }
 0x1ba   : > { %v674_v40 = vpop.f32.mrf.mxu0 }
 0x1bb   : > { %992 = vtanh.f32 %v673_v39 }
 0x1bc   : > { %v987_v41 = vpop.eup %986  ;;  %v677_v42 = vpop.f32.mrf.mxu1 }
 0x1bd   : > { %748 = vst [vmem:[%s1334_s20 + $0x8] sm:$0xff] %v987_v41  ;;  %v678_v43 = vadd.f32 %v1323_v24, %v677_v42 }
 0x1be   : > { %v679_v44 = vpop.f32.mrf.mxu1 }
 0x1bf   : > { %994 = vtanh.f32 %v678_v43 }
 0x1c0   : > { %v989_v45 = vpop.eup %988  ;;  %v682_v46 = vpop.f32.mrf.mxu1 }
 0x1c1   : > { %749 = vst [vmem:[%s1334_s20 + $0x10] sm:$0xff] %v989_v45  ;;  %v683_v47 = vadd.f32 %v1323_v24, %v682_v46 }
 0x1c2   : > { %v684_v48 = vpop.f32.mrf.mxu1 }
 0x1c3   : > { %996 = vtanh.f32 %v683_v47 }
 0x1c4   : > { %v991_v49 = vpop.eup %990  ;;  %v687_v50 = vpop.f32.mrf.mxu1 }
 0x1c5   : > { %750 = vst [vmem:[%s1334_s20 + $0x18] sm:$0xff] %v991_v49  ;;  %v688_v51 = vadd.f32 %v1323_v24, %v687_v50 }
 0x1c6   : > { %v689_v52 = vpop.f32.mrf.mxu1 }
 0x1c7   : > { %998 = vtanh.f32 %v688_v51 }
 0x1c8   : > { %v993_v53 = vpop.eup %992  ;;  %v692_v56 = vpop.f32.mrf.mxu1 }
 0x1c9   : > { %751 = vst [vmem:[%s1334_s20 + $0x20] sm:$0xff] %v993_v53  ;;  %v693_v57 = vadd.f32 %v1323_v24, %v692_v56 }
 0x1ca   : > { %v694_v58 = vpop.f32.mrf.mxu1 }
 0x1cb   : > { %1000 = vtanh.f32 %v693_v57 }
 0x1cc   : > { %v995_v59 = vpop.eup %994  ;;  %v697_v60 = vpop.f32.mrf.mxu1 }
 0x1cd   : > { %752 = vst [vmem:[%s1334_s20 + $0x28] sm:$0xff] %v995_v59  ;;  %v698_v61 = vadd.f32 %v1323_v24, %v697_v60 }
 0x1ce   : > { %v699_v62 = vpop.f32.mrf.mxu1 }
 0x1cf   : > { %1002 = vtanh.f32 %v698_v61 }
 0x1d0   : > { %v997_v63 = vpop.eup %996  ;;  %v702_v0 = vpop.f32.mrf.mxu1 }
 0x1d1   : > { %753 = vst [vmem:[%s1334_s20 + $0x30] sm:$0xff] %v997_v63  ;;  %v703_v1 = vadd.f32 %v1323_v24, %v702_v0 }
 0x1d2   : > { %v704_v2 = vpop.f32.mrf.mxu1 }
 0x1d3   : > { %1004 = vtanh.f32 %v703_v1 }
 0x1d4   : > { %v999_v3 = vpop.eup %998  ;;  %v707_v4 = vpop.f32.mrf.mxu1 }
 0x1d5   : > { %754 = vst [vmem:[%s1334_s20 + $0x38] sm:$0xff] %v999_v3  ;;  %v708_v5 = vadd.f32 %v1323_v24, %v707_v4 }
 0x1d6   : > { %v709_v6 = vpop.f32.mrf.mxu1 }
 0x1d7   : > { %1006 = vtanh.f32 %v708_v5 }
 0x1d8   : > { %v1001_v7 = vpop.eup %1000  ;;  %v712_v8 = vpop.f32.mrf.mxu1 }
 0x1d9   : > { %755 = vst [vmem:[%s1334_s20 + $0x40] sm:$0xff] %v1001_v7  ;;  %v713_v9 = vadd.f32 %v1323_v24, %v712_v8 }
 0x1da   : > { %v714_v10 = vpop.f32.mrf.mxu1 }
 0x1db   : > { %1008 = vtanh.f32 %v713_v9 }
 0x1dc   : > { %v1003_v11 = vpop.eup %1002  ;;  %v717_v12 = vpop.f32.mrf.mxu1 }
 0x1dd   : > { %756 = vst [vmem:[%s1334_s20 + $0x48] sm:$0xff] %v1003_v11  ;;  %v718_v13 = vadd.f32 %v1323_v24, %v717_v12 }
 0x1de   : > { %v719_v14 = vpop.f32.mrf.mxu1 }
 0x1df   : > { %1010 = vtanh.f32 %v718_v13 }
 0x1e0   : > { %v1005_v15 = vpop.eup %1004  ;;  %v722_v16 = vpop.f32.mrf.mxu1 }
 0x1e1   : > { %757 = vst [vmem:[%s1334_s20 + $0x50] sm:$0xff] %v1005_v15  ;;  %v723_v17 = vadd.f32 %v1323_v24, %v722_v16 }
 0x1e2   : > { %v724_v18 = vpop.f32.mrf.mxu1 }
 0x1e3   : > { %1012 = vtanh.f32 %v723_v17 }
 0x1e4   : > { %v1007_v19 = vpop.eup %1006  ;;  %v727_v20 = vpop.f32.mrf.mxu1 }
 0x1e5   : > { %758 = vst [vmem:[%s1334_s20 + $0x58] sm:$0xff] %v1007_v19  ;;  %v728_v21 = vadd.f32 %v1323_v24, %v727_v20 }
 0x1e6   : > { %v729_v54 = vpop.f32.mrf.mxu1 }
 0x1e7   : > { %1014 = vtanh.f32 %v728_v21 }
 0x1e8   : > { %v1009_v22 = vpop.eup %1008 }
 0x1e9   : > { %759 = vst [vmem:[%s1334_s20 + $0x60] sm:$0xff] %v1009_v22 }
 0x1ec   : > { %v1011_v55 = vpop.eup %1010 }
 0x1ed   : > { %760 = vst [vmem:[%s1334_s20 + $0x68] sm:$0xff] %v1011_v55 }
 0x1f0   : > { %v1013_v23 = vpop.eup %1012 }
 0x1f1   : > { %761 = vst [vmem:[%s1334_s20 + $0x70] sm:$0xff] %v1013_v23 }
 0x1f4   : > { %v1015_v25 = vpop.eup %1014 }
 0x1f5   : > { %762 = vst [vmem:[%s1334_s20 + $0x78] sm:$0xff] %v1015_v25 }
 0x1f6 PF: > { %s15_s18 = sadd.s32 1, %s1022_s18  }
 0x1f7   : > { %p12_p4 = scmp.ge.s32.totalorder %s15_s18, 4  }
 0x1f9   :  { %14 = sbr.rel (!%p12_p4) target bundleno = 1 (0x1), region = 70 }

</bundles_post_ra>
